<compile_context>
chip_gen: v7x
topology: tpu7x:2x2x1
jax: 0.10.0
libtpu: 0.0.40
codegen_flags: <defaults>
</compile_context>

<pallas_src>
import functools

import jax
import jax.numpy as jnp
from jax.experimental import pallas as pl
from jax.experimental.pallas import tpu as pltpu


_TARGET_BLOCK_BYTES = 2 * 1024 * 1024   # input-block size target (roofline ~1-4 MiB)
_VMEM_LIMIT_BYTES = 32 * 1024 * 1024    # well under v7x's 64 MiB physical VMEM


def _num_tensorcores() -> int:
    """Best-effort TensorCores-per-chip count (v7x: 2, v5e/v6e: 1)."""
    try:
        info = pltpu.get_tpu_info()
        for attr in ("num_cores", "core_count", "num_tensorcores",
                     "tensorcores_per_chip"):
            n = getattr(info, attr, None)
            if isinstance(n, int) and n > 1:
                return n
    except Exception:
        pass
    try:
        n = getattr(jax.devices()[0], "num_cores", None)
        if isinstance(n, int) and n > 1:
            return n
    except Exception:
        pass
    return 1


def _layer_norm_2d_kernel(x_ref, w_ref, b_ref, o_ref, *, eps: float):
    # x_ref block: (bb, C, Hb, Wb).  Spatial dims sit on (sublane, lane); the
    # channel reduction (axis=1) is a short VALU add chain over C vreg planes.
    x = x_ref[...].astype(jnp.float32)
    u = jnp.mean(x, axis=1, keepdims=True)           # (bb, 1, Hb, Wb)
    d = x - u
    s = jnp.mean(d * d, axis=1, keepdims=True)       # biased variance (torch semantics)
    inv = jax.lax.rsqrt(s + eps)                     # EUP rsqrt, not a VALU divide
    w = w_ref[...]                                   # (1, C, 1, 1) f32
    b = b_ref[...]
    o_ref[...] = (w * (d * inv) + b).astype(o_ref.dtype)


def _choose_tiling(B, C, H, W, itemsize, n_cores):
    """Pick (bb, hb, wb) so blocks exactly tile (B, H, W) and stay ~2 MiB."""
    target_elems = max(1, _TARGET_BLOCK_BYTES // itemsize)

    # W block: full extent unless W is a multiple of 128, in which case pick
    # the largest lane-aligned divisor of W that fits the element budget.
    if W % 128 == 0:
        wb = 128
        t = 128
        while t <= W:
            if W % t == 0 and C * 8 * t <= target_elems:
                wb = t
            t += 128
    else:
        wb = W  # full extent (e.g. SAM's 64-wide final stage); no relayout

    # H block: full extent unless H is a multiple of 8 (SAM shapes always are),
    # in which case pick the largest 8-aligned divisor of H within budget.
    if H % 8 == 0:
        hb = 8
        t = 8
        while t <= H:
            if H % t == 0 and C * t * wb <= target_elems:
                hb = t
            t += 8
    else:
        hb = H

    # Batch block: largest divisor of B that still fits the budget.
    bb = 1
    for cand in range(B, 0, -1):
        if B % cand == 0 and cand * C * hb * wb <= target_elems:
            bb = cand
            break

    # Megacore (v7x): only split when the chip really has >1 TensorCore and the
    # grid would otherwise starve a core.  Single-core v5e/v6e keep one
    # max-size step (splitting would only add per-step overhead).
    if n_cores > 1:
        def _steps():
            return (B // bb) * (H // hb) * (W // wb)

        while _steps() < n_cores and bb > 1:
            nb = 1
            for d in range(bb // 2, 0, -1):
                if bb % d == 0:
                    nb = d
                    break
            if nb == bb:
                break
            bb = nb
        while _steps() < n_cores and hb % 16 == 0 and hb > 8:
            hb //= 2
        while _steps() < n_cores and wb % 256 == 0 and wb > 128:
            wb //= 2

    return bb, hb, wb


def layer_norm_2d(x, weight, bias, eps: float = 1e-6):
    """x: (B, C, H, W) NCHW; weight/bias: (C,). Returns (B, C, H, W)."""
    B, C, H, W = x.shape
    itemsize = jnp.dtype(x.dtype).itemsize

    bb, hb, wb = _choose_tiling(B, C, H, W, itemsize, _num_tensorcores())

    w4 = weight.astype(jnp.float32).reshape(1, C, 1, 1)
    b4 = bias.astype(jnp.float32).reshape(1, C, 1, 1)

    cost = pl.CostEstimate(
        flops=7 * B * C * H * W,
        transcendentals=B * H * W,
        bytes_accessed=2 * B * C * H * W * itemsize + 2 * C * 4,
    )

    grid = (B // bb, H // hb, W // wb)

    out = pl.pallas_call(
        functools.partial(_layer_norm_2d_kernel, eps=eps),
        out_shape=jax.ShapeDtypeStruct((B, C, H, W), x.dtype),
        grid_spec=pltpu.PrefetchScalarGridSpec(
            num_scalar_prefetch=0,
            grid=grid,
            in_specs=[
                pl.BlockSpec((bb, C, hb, wb), lambda b, i, j: (b, 0, i, j)),
                pl.BlockSpec((1, C, 1, 1), lambda b, i, j: (0, 0, 0, 0)),
                pl.BlockSpec((1, C, 1, 1), lambda b, i, j: (0, 0, 0, 0)),
            ],
            out_specs=pl.BlockSpec((bb, C, hb, wb), lambda b, i, j: (b, 0, i, j)),
        ),
        compiler_params=pltpu.CompilerParams(
            dimension_semantics=("parallel", "parallel", "parallel"),
            vmem_limit_bytes=_VMEM_LIMIT_BYTES,
        ),
        cost_estimate=cost,
    )(x, w4, b4)

    return out


def _reference_layer_norm_2d(x, weight, bias, eps=1e-6):
    xf = x.astype(jnp.float32)
    u = xf.mean(axis=1, keepdims=True)
    s = ((xf - u) ** 2).mean(axis=1, keepdims=True)
    y = (xf - u) / jnp.sqrt(s + eps)
    return (weight[None, :, None, None] * y + bias[None, :, None, None]).astype(x.dtype)


if __name__ == "__main__":
    # Case 1: LayerNorm2d(mask_in_chans // 4) as used inside mask_downscaling.
    B, C, H, W = 2, 4, 16, 16
    key = jax.random.PRNGKey(0)
    x = jax.random.normal(key, (B, C, H, W), dtype=jnp.float32)
    weight = jnp.ones((C,), dtype=jnp.float32)   # matches nn.Parameter(torch.ones(C))
    bias = jnp.zeros((C,), dtype=jnp.float32)    # matches nn.Parameter(torch.zeros(C))

    out = jax.block_until_ready(layer_norm_2d(x, weight, bias, eps=1e-6))
    ref = _reference_layer_norm_2d(x, weight, bias, eps=1e-6)
    assert out.shape == (B, C, H, W)
    assert jnp.allclose(out, ref, atol=1e-5, rtol=1e-5)

    # Case 2: spatial extent that is neither 8- nor 128-aligned exercises the
    # full-extent (no pad / no slice) block path, with non-trivial weight/bias.
    B2, C2, H2, W2 = 1, 16, 12, 12
    x_b = jax.random.normal(jax.random.PRNGKey(0), (B2, C2, H2, W2), dtype=jnp.float32)
    w_b = jnp.full((C2,), 1.5, dtype=jnp.float32)
    b_b = jnp.full((C2,), 0.25, dtype=jnp.float32)

    out_b = jax.block_until_ready(layer_norm_2d(x_b, w_b, b_b, eps=1e-6))
    ref_b = _reference_layer_norm_2d(x_b, w_b, b_b, eps=1e-6)
    assert out_b.shape == (B2, C2, H2, W2)
    assert jnp.allclose(out_b, ref_b, atol=1e-5, rtol=1e-5)

    print("KERNEL_OK")
</pallas_src>

<mosaic_0001>
module attributes {stable_mosaic.version = 11 : i64} {
  func.func @_layer_norm_2d_kernel(%arg0: i32, %arg1: i32, %arg2: i32, %arg3: memref<2x4x16x16xf32, #tpu.memory_space<vmem>>, %arg4: memref<1x4x1x1xf32, #tpu.memory_space<vmem>>, %arg5: memref<1x4x1x1xf32, #tpu.memory_space<vmem>>, %arg6: memref<2x4x16x16xf32, #tpu.memory_space<vmem>>) attributes {dimension_semantics = [#tpu.dimension_semantics<parallel>, #tpu.dimension_semantics<parallel>, #tpu.dimension_semantics<parallel>], iteration_bounds = array<i64: 1, 1, 1>, scalar_prefetch = 0 : i64, scratch_operands = 0 : i64, tpu.core_type = #tpu.core_type<tc>, window_params = [{transform_indices = @transform_0, window_bounds = array<i64: 2, 4, 16, 16>}, {pipeline_mode = #tpu.pipeline_mode<synchronous>, transform_indices = @transform_1, window_bounds = array<i64: 1, 4, 1, 1>}, {pipeline_mode = #tpu.pipeline_mode<synchronous>, transform_indices = @transform_2, window_bounds = array<i64: 1, 4, 1, 1>}, {transform_indices = @transform_3, window_bounds = array<i64: 2, 4, 16, 16>}]} {
    %c0 = arith.constant 0 : index
    %c0_0 = arith.constant 0 : index
    %c0_1 = arith.constant 0 : index
    %c0_2 = arith.constant 0 : index
    %0 = vector.load %arg3[%c0, %c0_0, %c0_1, %c0_2] : memref<2x4x16x16xf32, #tpu.memory_space<vmem>>, vector<2x4x16x16xf32>
    %cst = arith.constant dense<0.000000e+00> : vector<2x16x16xf32>
    %1 = vector.multi_reduction <add>, %0, %cst [1] : vector<2x4x16x16xf32> to vector<2x16x16xf32>
    %2 = vector.shape_cast %1 : vector<2x16x16xf32> to vector<2x1x16x16xf32>
    %cst_3 = arith.constant 4.000000e+00 : f32
    %3 = vector.broadcast %cst_3 : f32 to vector<2x1x16x16xf32>
    %4 = arith.divf %2, %3 : vector<2x1x16x16xf32>
    %5 = vector.broadcast %4 : vector<2x1x16x16xf32> to vector<2x4x16x16xf32>
    %6 = arith.subf %0, %5 : vector<2x4x16x16xf32>
    %7 = arith.mulf %6, %6 : vector<2x4x16x16xf32>
    %cst_4 = arith.constant dense<0.000000e+00> : vector<2x16x16xf32>
    %8 = vector.multi_reduction <add>, %7, %cst_4 [1] : vector<2x4x16x16xf32> to vector<2x16x16xf32>
    %9 = vector.shape_cast %8 : vector<2x16x16xf32> to vector<2x1x16x16xf32>
    %cst_5 = arith.constant 4.000000e+00 : f32
    %10 = vector.broadcast %cst_5 : f32 to vector<2x1x16x16xf32>
    %11 = arith.divf %9, %10 : vector<2x1x16x16xf32>
    %cst_6 = arith.constant 9.99999997E-7 : f32
    %12 = vector.broadcast %cst_6 : f32 to vector<2x1x16x16xf32>
    %13 = arith.addf %11, %12 : vector<2x1x16x16xf32>
    %14 = math.rsqrt %13 : vector<2x1x16x16xf32>
    %c0_7 = arith.constant 0 : index
    %c0_8 = arith.constant 0 : index
    %c0_9 = arith.constant 0 : index
    %c0_10 = arith.constant 0 : index
    %15 = vector.load %arg4[%c0_7, %c0_8, %c0_9, %c0_10] : memref<1x4x1x1xf32, #tpu.memory_space<vmem>>, vector<1x4x1x1xf32>
    %c0_11 = arith.constant 0 : index
    %c0_12 = arith.constant 0 : index
    %c0_13 = arith.constant 0 : index
    %c0_14 = arith.constant 0 : index
    %16 = vector.load %arg5[%c0_11, %c0_12, %c0_13, %c0_14] : memref<1x4x1x1xf32, #tpu.memory_space<vmem>>, vector<1x4x1x1xf32>
    %17 = vector.broadcast %14 : vector<2x1x16x16xf32> to vector<2x4x16x16xf32>
    %18 = arith.mulf %6, %17 : vector<2x4x16x16xf32>
    %19 = vector.broadcast %15 : vector<1x4x1x1xf32> to vector<2x4x16x16xf32>
    %20 = arith.mulf %19, %18 : vector<2x4x16x16xf32>
    %21 = vector.broadcast %16 : vector<1x4x1x1xf32> to vector<2x4x16x16xf32>
    %22 = arith.addf %20, %21 : vector<2x4x16x16xf32>
    %c0_15 = arith.constant 0 : index
    %c0_16 = arith.constant 0 : index
    %c0_17 = arith.constant 0 : index
    %c0_18 = arith.constant 0 : index
    %23 = vector.load %arg6[%c0_15, %c0_16, %c0_17, %c0_18] : memref<2x4x16x16xf32, #tpu.memory_space<vmem>>, vector<2x4x16x16xf32>
    tpu.vector_store %arg6[%c0_15, %c0_16, %c0_17, %c0_18], %22 {strides = array<i32>} : memref<2x4x16x16xf32, #tpu.memory_space<vmem>>, vector<2x4x16x16xf32>,
    return
  }
  func.func @transform_0(%arg0: i32, %arg1: i32, %arg2: i32) -> (i32, i32, i32, i32) {
    %c0_i32 = arith.constant 0 : i32
    %c0_i32_0 = arith.constant 0 : i32
    return %arg0, %c0_i32, %arg1, %arg2 : i32, i32, i32, i32
  }
  func.func @transform_1(%arg0: i32, %arg1: i32, %arg2: i32) -> (i32, i32, i32, i32) {
    %c0_i32 = arith.constant 0 : i32
    %c0_i32_0 = arith.constant 0 : i32
    %c0_i32_1 = arith.constant 0 : i32
    %c0_i32_2 = arith.constant 0 : i32
    %c0_i32_3 = arith.constant 0 : i32
    return %c0_i32, %c0_i32_0, %c0_i32_1, %c0_i32_2 : i32, i32, i32, i32
  }
  func.func @transform_2(%arg0: i32, %arg1: i32, %arg2: i32) -> (i32, i32, i32, i32) {
    %c0_i32 = arith.constant 0 : i32
    %c0_i32_0 = arith.constant 0 : i32
    %c0_i32_1 = arith.constant 0 : i32
    %c0_i32_2 = arith.constant 0 : i32
    %c0_i32_3 = arith.constant 0 : i32
    return %c0_i32, %c0_i32_0, %c0_i32_1, %c0_i32_2 : i32, i32, i32, i32
  }
  func.func @transform_3(%arg0: i32, %arg1: i32, %arg2: i32) -> (i32, i32, i32, i32) {
    %c0_i32 = arith.constant 0 : i32
    %c0_i32_0 = arith.constant 0 : i32
    return %arg0, %c0_i32, %arg1, %arg2 : i32, i32, i32, i32
  }
}

</mosaic_0001>

<bundles_post_ra>
// kernel: tpu_custom_call.1
= control target key start
LH: loop header
LB: loop body
LE: loop exit
PB: predicated region body
PF: predicated region fallthrough
CT: control target
= control target key end

     0   :  { %8 = vsyncpa [#allocation3], 0  ;;  %s590_s0 = inlined_call_operand.hbm [shape: f32[2,4,16,16], index: 0, kind: input, shape index: {}]   ;;  %s591_s1 = inlined_call_operand.vmem [shape: f32[1,4,1,1], index: 1, kind: input, shape index: {}]   ;;  %s592_s2 = inlined_call_operand.vmem [shape: f32[1,4,1,1], index: 2, kind: input, shape index: {}]   ;;  %s593_s3 = inlined_call_operand.hbm [shape: f32[2,4,16,16], index: 3, kind: output, shape index: {}]  }
   0x1   :  { %9 = vsyncpa [#allocation4], 0  ;;  %s383_s12 = smov [#allocation2]   ;;  %s335_s16 = scalar_lea.hbm %s590_s0, 2048 }
   0x2   :  { %s15_s13 = sshll.u32 %s383_s12, 4  ;;  %p336_p0 = scmp.ne.s32.totalorder %s590_s0, %s335_s16  ;;  %s16_s13 = int_to_ptr.vmem [resolvable:$true] %s15_s13 }
   0x3   :  { %p339_p1 = scmp.lt.u32.totalorder %s335_s16, %s590_s0 }
   0x5   :  { %p341_p2 = pnand %p339_p1, %p336_p0 }
   0x7   :  { %344 = shalt.err (!%p341_p2)
}
   0x8   :  { %s345_s21 = scalar_lea.vmem %s16_s13, 2048  ;;  %p350_p4 = scmp.lt.s32.totalorder %s16_s13, %s16_s13 }
   0x9   :  { %p346_p3 = scmp.ne.s32.totalorder %s16_s13, %s345_s21  ;;  %p351_p5 = scmp.lt.s32.totalorder %s345_s21, %s345_s21 }
   0xb   :  { %p352_p6 = por %p351_p5, %p350_p4 }
   0xd   :  { %p353_p7 = pnand %p352_p6, %p346_p3 }
   0xf   :  { %356 = shalt.err (!%p353_p7)
}
  0x10   :  { %s384_s22 = smov 128   ;;  %s385_s23 = smov 8  }
  0x11   :  { %21 = dma.hbm_to_vmem [thread:$0]  %s590_s0, 2048, %s16_s13, [#allocation3], %s384_s22, %s384_s22, %s385_s23  }
  0x12   :  { %379 = dma.done.wait [#allocation3], 2048  }
  0x13   :  { %380 = vsyncadd [#allocation3], 4294965248  ;;  %v386_v0 = vmov 0   ;;  %v314_v1 = vld [vmem:[%s591_s1 + $0x2] ss:$0 sm:$0xff]  ;;  %vm45_vm0 = vcmask 130048  }
  0x14   :  { %326 = vset.pattern.permute.xlu1 %v386_v0  ;;  %325 = vset.pattern.permute.xlu0 %v386_v0  ;;  %v312_v2 = vld [vmem:[%s591_s1] ss:$0 sm:$0xff]  ;;  %v315_v3 = vld [vmem:[%s591_s1 + $0x3] ss:$0 sm:$0xff]  ;;  %v313_v4 = vld [vmem:[%s591_s1 + $0x1] ss:$0 sm:$0xff] }
  0x15   :  { %204 = vperm.xlu1 %326, %v314_v1   ;;  %196 = vperm.xlu0 %325, %v312_v2   ;;  %v317_v5 = vld [vmem:[%s592_s2 + $0x1] ss:$0 sm:$0xff]  ;;  %v316_v6 = vld [vmem:[%s592_s2] ss:$0 sm:$0xff]  ;;  %v319_v7 = vld [vmem:[%s592_s2 + $0x3] ss:$0 sm:$0xff] }
  0x16   :  { %v318_v8 = vld [vmem:[%s592_s2 + $0x2] ss:$0 sm:$0xff]  ;;  %v31_v10 = vld [vmem:[#allocation2 + $0x10] sm:$0xff]  ;;  %v30_v11 = vld [vmem:[#allocation2 + $0x8] sm:$0xff]  ;;  %s387_s1 = smov [#allocation5]  }
  0x17   :  { %v29_v9 = vld [vmem:[#allocation2] sm:$0xff]  ;;  %v32_v12 = vld [vmem:[#allocation2 + $0x18] sm:$0xff]  ;;  %v39_v14 = vld [vmem:[#allocation2 + $0x50] sm:$0xff]  ;;  %v47_v18 = vsel %vm45_vm0, %v31_v10, 0.0  ;;  %v53_v20 = vsel %vm45_vm0, %v30_v11, 0.0  ;;  %s300_s2 = sshll.u32 %s387_s1, 4  ;;  %s301_s2 = int_to_ptr.vmem [resolvable:$true] %s300_s2 }
  0x18   :  { %v37_v13 = vld [vmem:[#allocation2 + $0x40] sm:$0xff]  ;;  %v38_v15 = vld [vmem:[#allocation2 + $0x48] sm:$0xff]  ;;  %v40_v16 = vld [vmem:[#allocation2 + $0x58] sm:$0xff]  ;;  %v46_v17 = vsel %vm45_vm0, %v29_v9, 0.0  ;;  %v54_v21 = vsel %vm45_vm0, %v32_v12, 0.0  ;;  %v61_v24 = vsel %vm45_vm0, %v39_v14, 0.0  ;;  %p362_p9 = scmp.lt.s32.totalorder %s301_s2, %s301_s2 }
  0x19   :  { %208 = vperm.xlu1 %326, %v315_v3   ;;  %200 = vperm.xlu0 %325, %v313_v4   ;;  %v33_v19 = vld [vmem:[#allocation2 + $0x20] sm:$0xff]  ;;  %v34_v22 = vld [vmem:[#allocation2 + $0x28] sm:$0xff]  ;;  %v60_v23 = vsel %vm45_vm0, %v37_v13, 0.0  ;;  %v48_v26 = vadd.f32 %v47_v18, %v46_v17  ;;  %v67_v27 = vsel %vm45_vm0, %v38_v15, 0.0  ;;  %v68_v28 = vsel %vm45_vm0, %v40_v16, 0.0  ;;  %v35_v32 = vld [vmem:[#allocation2 + $0x30] sm:$0xff] }
  0x1a   :  { %v41_v25 = vld [vmem:[#allocation2 + $0x60] sm:$0xff]  ;;  %v42_v29 = vld [vmem:[#allocation2 + $0x68] sm:$0xff]  ;;  %v49_v30 = vsel %vm45_vm0, %v33_v19, 0.0  ;;  %v55_v31 = vadd.f32 %v54_v21, %v53_v20  ;;  %v56_v33 = vsel %vm45_vm0, %v34_v22, 0.0  ;;  %v62_v34 = vadd.f32 %v61_v24, %v60_v23  ;;  %v36_v35 = vld [vmem:[#allocation2 + $0x38] sm:$0xff]  ;;  %s357_s14 = scalar_lea.vmem %s301_s2, 2048 }
  0x1b   :  { %v63_v36 = vsel %vm45_vm0, %v41_v25, 0.0  ;;  %v69_v37 = vadd.f32 %v68_v28, %v67_v27  ;;  %v43_v38 = vld [vmem:[#allocation2 + $0x70] sm:$0xff]  ;;  %v50_v39 = vadd.f32 %v49_v30, %v48_v26  ;;  %v70_v40 = vsel %vm45_vm0, %v42_v29, 0.0  ;;  %v44_v41 = vld [vmem:[#allocation2 + $0x78] sm:$0xff]  ;;  %p358_p8 = scmp.ne.s32.totalorder %s301_s2, %s357_s14  ;;  %p363_p10 = scmp.lt.s32.totalorder %s357_s14, %s357_s14 }
  0x1c   :  { %v51_v42 = vsel %vm45_vm0, %v35_v32, 0.0  ;;  %v57_v43 = vadd.f32 %v56_v33, %v55_v31  ;;  %v58_v44 = vsel %vm45_vm0, %v36_v35, 0.0  ;;  %v64_v45 = vadd.f32 %v63_v36, %v62_v34 }
  0x1d   :  { %252 = vperm.xlu1 %326, %v317_v5   ;;  %248 = vperm.xlu0 %325, %v316_v6   ;;  %v65_v46 = vsel %vm45_vm0, %v43_v38, 0.0  ;;  %v71_v47 = vadd.f32 %v70_v40, %v69_v37  ;;  %v52_v48 = vadd.f32 %v51_v42, %v50_v39  ;;  %v72_v49 = vsel %vm45_vm0, %v44_v41, 0.0  ;;  %p364_p11 = por %p363_p10, %p362_p9 }
  0x1e   :  { %v59_v50 = vadd.f32 %v58_v44, %v57_v43  ;;  %v66_v51 = vadd.f32 %v65_v46, %v64_v45 }
  0x1f   :  { %v73_v52 = vadd.f32 %v72_v49, %v71_v47  ;;  %v75_v53 = vmul.f32 0.25, %v52_v48  ;;  %p365_p12 = pnand %p364_p11, %p358_p8 }
  0x20   :  { %v76_v54 = vmul.f32 0.25, %v59_v50  ;;  %v77_v55 = vmul.f32 0.25, %v66_v51 }
  0x21   :  { %260 = vperm.xlu1 %326, %v319_v7   ;;  %256 = vperm.xlu0 %325, %v318_v8   ;;  %v78_v56 = vmul.f32 0.25, %v73_v52  ;;  %v463_v57 = vsub.f32 %v29_v9, %v75_v53  ;;  %v465_v58 = vsub.f32 %v31_v10, %v75_v53  ;;  %v479_v1 = vsub.f32 %v33_v19, %v75_v53 }
  0x22   :  { %v467_v59 = vsub.f32 %v30_v11, %v76_v54  ;;  %v469_v60 = vsub.f32 %v32_v12, %v76_v54  ;;  %v471_v61 = vsub.f32 %v37_v13, %v77_v55  ;;  %v473_v62 = vsub.f32 %v39_v14, %v77_v55 }
  0x23   :  { %v475_v63 = vsub.f32 %v38_v15, %v78_v56  ;;  %v477_v0 = vsub.f32 %v40_v16, %v78_v56  ;;  %v95_v2 = vmul.f32 %v463_v57, %v463_v57  ;;  %v97_v3 = vmul.f32 %v465_v58, %v465_v58 }
  0x24   :  { %v485_v4 = vsub.f32 %v34_v22, %v76_v54  ;;  %v96_v5 = vmul.f32 %v467_v59, %v467_v59  ;;  %v98_v6 = vmul.f32 %v469_v60, %v469_v60  ;;  %v491_v7 = vsub.f32 %v41_v25, %v77_v55 }
  0x25   :  { %v103_v8 = vmul.f32 %v471_v61, %v471_v61  ;;  %v105_v9 = vmul.f32 %v473_v62, %v473_v62  ;;  %v497_v10 = vsub.f32 %v35_v32, %v75_v53  ;;  %v499_v11 = vsub.f32 %v42_v29, %v78_v56 }
  0x26   :  { %v104_v12 = vmul.f32 %v475_v63, %v475_v63  ;;  %v106_v13 = vmul.f32 %v477_v0, %v477_v0  ;;  %v505_v14 = vsub.f32 %v36_v35, %v76_v54  ;;  %v99_v15 = vmul.f32 %v479_v1, %v479_v1 }
  0x27   :  { %v111_v16 = vsel %vm45_vm0, %v95_v2, 0.0  ;;  %v112_v17 = vsel %vm45_vm0, %v97_v3, 0.0  ;;  %v511_v18 = vsub.f32 %v43_v38, %v77_v55  ;;  %v100_v19 = vmul.f32 %v485_v4, %v485_v4 }
  0x28   :  { %v118_v20 = vsel %vm45_vm0, %v96_v5, 0.0  ;;  %v119_v21 = vsel %vm45_vm0, %v98_v6, 0.0  ;;  %v517_v22 = vsub.f32 %v44_v41, %v78_v56  ;;  %v107_v23 = vmul.f32 %v491_v7, %v491_v7 }
  0x29   :  { %v125_v24 = vsel %vm45_vm0, %v103_v8, 0.0  ;;  %v126_v25 = vsel %vm45_vm0, %v105_v9, 0.0  ;;  %v108_v26 = vmul.f32 %v499_v11, %v499_v11  ;;  %v113_v27 = vadd.f32 %v112_v17, %v111_v16 }
  0x2a   :  { %v132_v28 = vsel %vm45_vm0, %v104_v12, 0.0  ;;  %v133_v29 = vsel %vm45_vm0, %v106_v13, 0.0  ;;  %v101_v30 = vmul.f32 %v497_v10, %v497_v10  ;;  %v114_v31 = vsel %vm45_vm0, %v99_v15, 0.0 }
  0x2b   :  { %v120_v32 = vadd.f32 %v119_v21, %v118_v20  ;;  %v102_v33 = vmul.f32 %v505_v14, %v505_v14  ;;  %v121_v34 = vsel %vm45_vm0, %v100_v19, 0.0  ;;  %v127_v35 = vadd.f32 %v126_v25, %v125_v24 }
  0x2c   :  { %v109_v36 = vmul.f32 %v511_v18, %v511_v18  ;;  %v128_v37 = vsel %vm45_vm0, %v107_v23, 0.0  ;;  %v134_v38 = vadd.f32 %v133_v29, %v132_v28  ;;  %v110_v39 = vmul.f32 %v517_v22, %v517_v22 }
  0x2d   :  { %v115_v40 = vadd.f32 %v114_v31, %v113_v27  ;;  %v135_v41 = vsel %vm45_vm0, %v108_v26, 0.0  ;;  %v116_v42 = vsel %vm45_vm0, %v101_v30, 0.0  ;;  %v122_v43 = vadd.f32 %v121_v34, %v120_v32 }
  0x2e   :  { %v123_v44 = vsel %vm45_vm0, %v102_v33, 0.0  ;;  %v129_v45 = vadd.f32 %v128_v37, %v127_v35  ;;  %v130_v46 = vsel %vm45_vm0, %v109_v36, 0.0  ;;  %v136_v47 = vadd.f32 %v135_v41, %v134_v38 }
  0x2f   :  { %v117_v48 = vadd.f32 %v116_v42, %v115_v40  ;;  %v137_v49 = vsel %vm45_vm0, %v110_v39, 0.0  ;;  %v124_v50 = vadd.f32 %v123_v44, %v122_v43 }
  0x30   :  { %v131_v51 = vadd.f32 %v130_v46, %v129_v45  ;;  %v138_v52 = vadd.f32 %v137_v49, %v136_v47 }
  0x31   :  { %v139_v53 = vmul.f32 0.25, %v117_v48  ;;  %v140_v54 = vmul.f32 0.25, %v124_v50 }
  0x32   :  { %v141_v55 = vmul.f32 0.25, %v131_v51  ;;  %v142_v56 = vmul.f32 0.25, %v138_v52 }
  0x33   :  { %v143_v2 = vadd.f32 1e-06, %v139_v53  ;;  %v144_v3 = vadd.f32 1e-06, %v140_v54 }
  0x34   :  { %v145_v5 = vadd.f32 1e-06, %v141_v55  ;;  %v146_v6 = vadd.f32 1e-06, %v142_v56 }
  0x35   :  { %327 = vrsqrt.f32 %v143_v2 }
  0x36   :  { %329 = vrsqrt.f32 %v144_v3 }
  0x37   :  { %331 = vrsqrt.f32 %v145_v5 }
  0x38   :  { %333 = vrsqrt.f32 %v146_v6 }
  0x3f   :  { %v328_v8 = vpop.eup %327 }
  0x40   :  { %v330_v9 = vpop.eup %329  ;;  %v161_v17 = vmul.f32 %v328_v8, %v465_v58  ;;  %v159_v23 = vmul.f32 %v328_v8, %v463_v57  ;;  %v165_v29 = vmul.f32 %v328_v8, %v497_v10 }
  0x41   :  { %v332_v12 = vpop.eup %331  ;;  %v162_v19 = vmul.f32 %v330_v9, %v469_v60  ;;  %v160_v24 = vmul.f32 %v330_v9, %v467_v59  ;;  %v166_v58 = vmul.f32 %v330_v9, %v505_v14  ;;  %v163_v60 = vmul.f32 %v328_v8, %v479_v1 }
  0x42   :  { %v334_v16 = vpop.eup %333  ;;  %v169_v20 = vmul.f32 %v332_v12, %v473_v62  ;;  %v167_v25 = vmul.f32 %v332_v12, %v471_v61  ;;  %v164_v62 = vmul.f32 %v330_v9, %v485_v4  ;;  %v171_v59 = vmul.f32 %v332_v12, %v491_v7 }
  0x43   :  { %v170_v21 = vmul.f32 %v334_v16, %v477_v0  ;;  %v168_v26 = vmul.f32 %v334_v16, %v475_v63  ;;  %v173_v0 = vmul.f32 %v332_v12, %v511_v18  ;;  %v174_v57 = vmul.f32 %v334_v16, %v517_v22 }
  0x44   :  { %v172_v61 = vmul.f32 %v334_v16, %v499_v11 }
  0x94   :  { %v205_v13 = vpop.permute.xlu1 %204  ;;  %v197_v15 = vpop.permute.xlu0 %196 }
  0x95   :  { %v211_v33 = vmul.f32 %v197_v15, %v159_v23  ;;  %v212_v10 = vmul.f32 %v197_v15, %v160_v24  ;;  %v219_v34 = vmul.f32 %v197_v15, %v167_v25  ;;  %v220_v14 = vmul.f32 %v197_v15, %v168_v26 }
  0x96   :  { %v215_v45 = vmul.f32 %v205_v13, %v163_v60  ;;  %v216_v46 = vmul.f32 %v205_v13, %v164_v62  ;;  %v223_v47 = vmul.f32 %v205_v13, %v171_v59  ;;  %v224_v48 = vmul.f32 %v205_v13, %v172_v61 }
  0x98   :  { %v209_v27 = vpop.permute.xlu1 %208  ;;  %v201_v28 = vpop.permute.xlu0 %200 }
  0x99   :  { %v213_v30 = vmul.f32 %v201_v28, %v161_v17  ;;  %v214_v63 = vmul.f32 %v201_v28, %v162_v19  ;;  %v221_v31 = vmul.f32 %v201_v28, %v169_v20  ;;  %v222_v32 = vmul.f32 %v201_v28, %v170_v21 }
  0x9a   :  { %v217_v11 = vmul.f32 %v209_v27, %v165_v29  ;;  %v218_v40 = vmul.f32 %v209_v27, %v166_v58  ;;  %v225_v41 = vmul.f32 %v209_v27, %v173_v0  ;;  %v226_v42 = vmul.f32 %v209_v27, %v174_v57 }
  0x9c   :  { %v253_v35 = vpop.permute.xlu1 %252  ;;  %v249_v1 = vpop.permute.xlu0 %248 }
  0x9d   :  { %v265_v36 = vadd.f32 %v253_v35, %v213_v30  ;;  %v266_v4 = vadd.f32 %v253_v35, %v214_v63  ;;  %v273_v37 = vadd.f32 %v253_v35, %v221_v31  ;;  %v274_v18 = vadd.f32 %v253_v35, %v222_v32 }
  0x9e   :  { %v263_v38 = vadd.f32 %v249_v1, %v211_v33  ;;  %v264_v22 = vadd.f32 %v249_v1, %v212_v10  ;;  %v271_v39 = vadd.f32 %v249_v1, %v219_v34  ;;  %v272_v7 = vadd.f32 %v249_v1, %v220_v14 }
  0x9f   :  { %281 = vst.msk [vmem:[#allocation5 + $0x10] sm:$0xff] %vm45_vm0, %v265_v36  ;;  %282 = vst.msk [vmem:[#allocation5 + $0x18] sm:$0xff] %vm45_vm0, %v266_v4 }
  0xa0   :  { %289 = vst.msk [vmem:[#allocation5 + $0x50] sm:$0xff] %vm45_vm0, %v273_v37  ;;  %290 = vst.msk [vmem:[#allocation5 + $0x58] sm:$0xff] %vm45_vm0, %v274_v18  ;;  %v261_v43 = vpop.permute.xlu1 %260  ;;  %v257_v44 = vpop.permute.xlu0 %256 }
  0xa1   :  { %279 = vst.msk [vmem:[#allocation5] sm:$0xff] %vm45_vm0, %v263_v38  ;;  %280 = vst.msk [vmem:[#allocation5 + $0x8] sm:$0xff] %vm45_vm0, %v264_v22  ;;  %v269_v49 = vadd.f32 %v261_v43, %v217_v11  ;;  %v270_v50 = vadd.f32 %v261_v43, %v218_v40  ;;  %v277_v51 = vadd.f32 %v261_v43, %v225_v41 }
  0xa2   :  { %287 = vst.msk [vmem:[#allocation5 + $0x40] sm:$0xff] %vm45_vm0, %v271_v39  ;;  %288 = vst.msk [vmem:[#allocation5 + $0x48] sm:$0xff] %vm45_vm0, %v272_v7  ;;  %v278_v52 = vadd.f32 %v261_v43, %v226_v42  ;;  %v267_v53 = vadd.f32 %v257_v44, %v215_v45  ;;  %v268_v54 = vadd.f32 %v257_v44, %v216_v46 }
  0xa3   :  { %v275_v55 = vadd.f32 %v257_v44, %v223_v47  ;;  %v276_v56 = vadd.f32 %v257_v44, %v224_v48  ;;  %285 = vst.msk [vmem:[#allocation5 + $0x30] sm:$0xff] %vm45_vm0, %v269_v49  ;;  %286 = vst.msk [vmem:[#allocation5 + $0x38] sm:$0xff] %vm45_vm0, %v270_v50 }
  0xa4   :  { %293 = vst.msk [vmem:[#allocation5 + $0x70] sm:$0xff] %vm45_vm0, %v277_v51  ;;  %294 = vst.msk [vmem:[#allocation5 + $0x78] sm:$0xff] %vm45_vm0, %v278_v52 }
  0xa5   :  { %283 = vst.msk [vmem:[#allocation5 + $0x20] sm:$0xff] %vm45_vm0, %v267_v53  ;;  %284 = vst.msk [vmem:[#allocation5 + $0x28] sm:$0xff] %vm45_vm0, %v268_v54 }
  0xa6   :  { %291 = vst.msk [vmem:[#allocation5 + $0x60] sm:$0xff] %vm45_vm0, %v275_v55  ;;  %292 = vst.msk [vmem:[#allocation5 + $0x68] sm:$0xff] %vm45_vm0, %v276_v56 }
  0xa7   :  { %368 = shalt.err (!%p365_p12)
}
  0xa8   :  { %s369_s17 = scalar_lea.hbm %s593_s3, 2048 }
  0xa9   :  { %p370_p13 = scmp.ne.s32.totalorder %s593_s3, %s369_s17  ;;  %p373_p0 = scmp.lt.u32.totalorder %s369_s17, %s593_s3 }
  0xab   :  { %p375_p1 = pnand %p373_p0, %p370_p13 }
  0xad   :  { %378 = shalt.err (!%p375_p1)
}
  0xae   :  { %306 = dma.vmem_to_hbm [thread:$0]  %s301_s2, 2048, %s593_s3, [#allocation4], %s384_s22, %s384_s22, %s385_s23  }
  0xaf   :  { %381 = dma.done.wait [#allocation4], 2048  }
  0xb0   :  { %382 = vsyncadd [#allocation4], 4294965248 }
  0xb1   :  { %310 = vsyncpa [#allocation3], 1 }
  0xb2   :  { %311 = vsyncpa [#allocation4], 1 }

</bundles_post_ra>
